<compile_context>
chip_gen: v6e
topology: v6e:2x2x1
jax: 0.10.0
libtpu: 0.0.40
codegen_flags: <defaults>
</compile_context>

<pallas_src>
import functools

import jax
import jax.numpy as jnp
from jax.experimental import pallas as pl
from jax.experimental.pallas import tpu as pltpu


def _ffn_kernel(x_ref, w1_ref, b1_ref, w2_ref, b2_ref, o_ref):
    x = x_ref[...]                                                     # (tm, H) io dtype
    # First conv1d(k=1): MXU matmul with f32 accumulation.
    h = jnp.dot(x, w1_ref[...], preferred_element_type=jnp.float32)   # (tm, H) f32
    h = h + b1_ref[...]                                                # bias in f32
    h = jnp.maximum(h, 0.0)                                            # ReLU in f32
    # Feed the second MXU pass at the weights' (native) precision.
    h = h.astype(w2_ref.dtype)
    y = jnp.dot(h, w2_ref[...], preferred_element_type=jnp.float32)   # (tm, H) f32
    y = y + b2_ref[...]
    y = y + x.astype(jnp.float32)                                      # residual in f32
    o_ref[...] = y.astype(o_ref.dtype)


@functools.partial(jax.jit, static_argnames=("tm",))
def pointwise_feedforward(x, w1, b1, w2, b2, *, tm=512):
    """x: (B, L, H); w1/w2: (H_out, H_in) conv1d weights (kernel dim squeezed); b: (H,)."""
    B, L, H = x.shape
    io_dtype = x.dtype
    n_rows = B * L

    # Sublane alignment for the IO dtype (8 rows for f32, 16 for bf16).
    sub = 16 if jnp.dtype(io_dtype).itemsize == 2 else 8
    rows_aligned = pl.cdiv(n_rows, sub) * sub

    # Effective row tile: as fat as requested, aligned, clamped to the data.
    tm_eff = max(sub, min(int(tm), rows_aligned))
    tm_eff = pl.cdiv(tm_eff, sub) * sub
    # Keep >=2 grid iterations when there is enough data, so the "parallel"
    # grid axis can be split across v7x's two TensorCores.
    if rows_aligned >= 2 * sub and pl.cdiv(rows_aligned, tm_eff) < 2:
        tm_eff = pl.cdiv(pl.cdiv(rows_aligned, 2), sub) * sub

    n_pad = pl.cdiv(n_rows, tm_eff) * tm_eff
    grid = (n_pad // tm_eff,)

    x2 = x.reshape(n_rows, H)
    if n_pad != n_rows:
        x2 = jnp.pad(x2, ((0, n_pad - n_rows), (0, 0)))

    # Conv1d(k=1) weights are (H_out, H_in); pre-transpose so the kernel does
    # plain x @ W. Weights are fed to the MXU at the IO precision; biases stay
    # f32 (elementwise math is f32 everywhere, incl. v5e which lacks bf16 VPU).
    w_dtype = io_dtype
    w1_t = jnp.transpose(w1).astype(w_dtype)
    w2_t = jnp.transpose(w2).astype(w_dtype)
    b1_r = b1.reshape(1, H).astype(jnp.float32)
    b2_r = b2.reshape(1, H).astype(jnp.float32)

    io_bytes = jnp.dtype(io_dtype).itemsize
    w_bytes = jnp.dtype(w_dtype).itemsize
    # VMEM budget: double-buffered x/out tiles + double-buffered resident
    # weights + biases, plus headroom. (At much larger H, switch the weight
    # specs to pipeline_mode=pl.Buffered(1) or bf16 to fit v7x's 64 MiB.)
    vmem_bytes = (2 * 2 * tm_eff * H * io_bytes      # x + out tiles, 2-deep
                  + 2 * 2 * H * H * w_bytes          # W1^T + W2^T, 2-deep
                  + 2 * 2 * 1 * H * 4)               # biases
    vmem_limit = min(max(int(vmem_bytes * 1.5) + (4 << 20), 32 << 20), 64 << 20)

    cost = pl.CostEstimate(
        flops=4 * n_pad * H * H,                     # two (n_pad, H) x (H, H) matmuls
        transcendentals=0,
        bytes_accessed=2 * n_pad * H * io_bytes + 2 * H * H * w_bytes + 2 * H * 4,
    )

    out = pl.pallas_call(
        _ffn_kernel,
        out_shape=jax.ShapeDtypeStruct((n_pad, H), io_dtype),
        grid_spec=pltpu.PrefetchScalarGridSpec(
            num_scalar_prefetch=0,
            grid=grid,
            in_specs=[
                pl.BlockSpec((tm_eff, H), lambda i: (i, 0)),   # x tile
                pl.BlockSpec((H, H), lambda i: (0, 0)),        # W1^T (resident)
                pl.BlockSpec((1, H), lambda i: (0, 0)),        # b1
                pl.BlockSpec((H, H), lambda i: (0, 0)),        # W2^T (resident)
                pl.BlockSpec((1, H), lambda i: (0, 0)),        # b2
            ],
            out_specs=pl.BlockSpec((tm_eff, H), lambda i: (i, 0)),
        ),
        compiler_params=pltpu.CompilerParams(
            dimension_semantics=("parallel",),
            vmem_limit_bytes=vmem_limit,
        ),
        cost_estimate=cost,
    )(x2, w1_t, b1_r, w2_t, b2_r)

    return out[:n_rows].reshape(B, L, H)


def _reference(x, w1, b1, w2, b2):
    h = jnp.einsum("blh,oh->blo", x, w1) + b1
    h = jnp.maximum(h, 0.0)
    y = jnp.einsum("blh,oh->blo", h, w2) + b2
    return y + x


if __name__ == "__main__":
    # Small shapes; L deliberately NOT a multiple of the tile to exercise the
    # cdiv + padding path. H is a multiple of 128 for lane density.
    B, L, H = 2, 37, 128
    key = jax.random.PRNGKey(0)
    kx, k1, k2, k3, k4 = jax.random.split(key, 5)

    # bf16 token IO (the memory-bound fast path); params generated like
    # nn.Conv1d defaults (weight (H_out, H_in, 1) squeezed, uniform +-1/sqrt(H)).
    x = jax.random.normal(kx, (B, L, H), dtype=jnp.float32).astype(jnp.bfloat16)
    bound = 1.0 / float(H) ** 0.5
    w1 = jax.random.uniform(k1, (H, H), jnp.float32, -bound, bound)
    b1 = jax.random.uniform(k2, (H,), jnp.float32, -bound, bound)
    w2 = jax.random.uniform(k3, (H, H), jnp.float32, -bound, bound)
    b2 = jax.random.uniform(k4, (H,), jnp.float32, -bound, bound)

    out = pointwise_feedforward(x, w1, b1, w2, b2, tm=512)
    out = jax.block_until_ready(out)

    # Reference in f32 using the same bf16-quantized x / weights the kernel sees.
    ref = _reference(
        x.astype(jnp.float32),
        w1.astype(jnp.bfloat16).astype(jnp.float32), b1,
        w2.astype(jnp.bfloat16).astype(jnp.float32), b2,
    )
    assert out.shape == (B, L, H)
    assert jnp.allclose(out.astype(jnp.float32), ref, atol=5e-2, rtol=5e-2), \
        "mismatch vs reference"
    print("KERNEL_OK")
</pallas_src>

<mosaic_0001>
module attributes {stable_mosaic.version = 11 : i64} {
  func.func @_ffn_kernel(%arg0: i32, %arg1: memref<48x128xbf16, #tpu.memory_space<vmem>>, %arg2: memref<128x128xbf16, #tpu.memory_space<vmem>>, %arg3: memref<1x128xf32, #tpu.memory_space<vmem>>, %arg4: memref<128x128xbf16, #tpu.memory_space<vmem>>, %arg5: memref<1x128xf32, #tpu.memory_space<vmem>>, %arg6: memref<48x128xbf16, #tpu.memory_space<vmem>>) attributes {dimension_semantics = [#tpu.dimension_semantics<parallel>], iteration_bounds = array<i64: 2>, scalar_prefetch = 0 : i64, scratch_operands = 0 : i64, tpu.core_type = #tpu.core_type<tc>, window_params = [{transform_indices = @transform_0, window_bounds = array<i64: 48, 128>}, {pipeline_mode = #tpu.pipeline_mode<synchronous>, transform_indices = @transform_1, window_bounds = array<i64: 128, 128>}, {pipeline_mode = #tpu.pipeline_mode<synchronous>, transform_indices = @transform_2, window_bounds = array<i64: 1, 128>}, {pipeline_mode = #tpu.pipeline_mode<synchronous>, transform_indices = @transform_3, window_bounds = array<i64: 128, 128>}, {pipeline_mode = #tpu.pipeline_mode<synchronous>, transform_indices = @transform_4, window_bounds = array<i64: 1, 128>}, {transform_indices = @transform_5, window_bounds = array<i64: 48, 128>}]} {
    %c0 = arith.constant 0 : index
    %c0_0 = arith.constant 0 : index
    %0 = vector.load %arg1[%c0, %c0_0] : memref<48x128xbf16, #tpu.memory_space<vmem>>, vector<48x128xbf16>
    %c0_1 = arith.constant 0 : index
    %c0_2 = arith.constant 0 : index
    %1 = vector.load %arg2[%c0_1, %c0_2] : memref<128x128xbf16, #tpu.memory_space<vmem>>, vector<128x128xbf16>
    %cst = arith.constant dense<0.000000e+00> : vector<48x128xf32>
    %2 = tpu.matmul %0, %1, %cst {dimension_numbers = #tpu.dot_dimension_numbers<[1], [0], [0], [1], [0, 0, 1, 1], [], []>} : vector<48x128xbf16>, vector<128x128xbf16>, vector<48x128xf32> -> vector<48x128xf32>
    %c0_3 = arith.constant 0 : index
    %c0_4 = arith.constant 0 : index
    %3 = vector.load %arg3[%c0_3, %c0_4] : memref<1x128xf32, #tpu.memory_space<vmem>>, vector<1x128xf32>
    %4 = vector.broadcast %3 : vector<1x128xf32> to vector<48x128xf32>
    %5 = arith.addf %2, %4 : vector<48x128xf32>
    %cst_5 = arith.constant 0.000000e+00 : f32
    %6 = vector.broadcast %cst_5 : f32 to vector<48x128xf32>
    %7 = arith.maximumf %5, %6 : vector<48x128xf32>
    %8 = arith.truncf %7 : vector<48x128xf32> to vector<48x128xbf16>
    %c0_6 = arith.constant 0 : index
    %c0_7 = arith.constant 0 : index
    %9 = vector.load %arg4[%c0_6, %c0_7] : memref<128x128xbf16, #tpu.memory_space<vmem>>, vector<128x128xbf16>
    %cst_8 = arith.constant dense<0.000000e+00> : vector<48x128xf32>
    %10 = tpu.matmul %8, %9, %cst_8 {dimension_numbers = #tpu.dot_dimension_numbers<[1], [0], [0], [1], [0, 0, 1, 1], [], []>} : vector<48x128xbf16>, vector<128x128xbf16>, vector<48x128xf32> -> vector<48x128xf32>
    %c0_9 = arith.constant 0 : index
    %c0_10 = arith.constant 0 : index
    %11 = vector.load %arg5[%c0_9, %c0_10] : memref<1x128xf32, #tpu.memory_space<vmem>>, vector<1x128xf32>
    %12 = vector.broadcast %11 : vector<1x128xf32> to vector<48x128xf32>
    %13 = arith.addf %10, %12 : vector<48x128xf32>
    %14 = arith.extf %0 : vector<48x128xbf16> to vector<48x128xf32>
    %15 = arith.addf %13, %14 : vector<48x128xf32>
    %16 = arith.truncf %15 : vector<48x128xf32> to vector<48x128xbf16>
    %c0_11 = arith.constant 0 : index
    %c0_12 = arith.constant 0 : index
    %17 = vector.load %arg6[%c0_11, %c0_12] : memref<48x128xbf16, #tpu.memory_space<vmem>>, vector<48x128xbf16>
    tpu.vector_store %arg6[%c0_11, %c0_12], %16 {strides = array<i32>} : memref<48x128xbf16, #tpu.memory_space<vmem>>, vector<48x128xbf16>,
    return
  }
  func.func @transform_0(%arg0: i32) -> (i32, i32) {
    %c0_i32 = arith.constant 0 : i32
    %c0_i32_0 = arith.constant 0 : i32
    return %arg0, %c0_i32 : i32, i32
  }
  func.func @transform_1(%arg0: i32) -> (i32, i32) {
    %c0_i32 = arith.constant 0 : i32
    %c0_i32_0 = arith.constant 0 : i32
    %c0_i32_1 = arith.constant 0 : i32
    return %c0_i32, %c0_i32_0 : i32, i32
  }
  func.func @transform_2(%arg0: i32) -> (i32, i32) {
    %c0_i32 = arith.constant 0 : i32
    %c0_i32_0 = arith.constant 0 : i32
    %c0_i32_1 = arith.constant 0 : i32
    return %c0_i32, %c0_i32_0 : i32, i32
  }
  func.func @transform_3(%arg0: i32) -> (i32, i32) {
    %c0_i32 = arith.constant 0 : i32
    %c0_i32_0 = arith.constant 0 : i32
    %c0_i32_1 = arith.constant 0 : i32
    return %c0_i32, %c0_i32_0 : i32, i32
  }
  func.func @transform_4(%arg0: i32) -> (i32, i32) {
    %c0_i32 = arith.constant 0 : i32
    %c0_i32_0 = arith.constant 0 : i32
    %c0_i32_1 = arith.constant 0 : i32
    return %c0_i32, %c0_i32_0 : i32, i32
  }
  func.func @transform_5(%arg0: i32) -> (i32, i32) {
    %c0_i32 = arith.constant 0 : i32
    %c0_i32_0 = arith.constant 0 : i32
    return %arg0, %c0_i32 : i32, i32
  }
}

</mosaic_0001>

<bundles_post_ra>
// kernel: pointwise_feedforward.1
= control target key start
LH: loop header
LB: loop body
LE: loop exit
PB: predicated region body
PF: predicated region fallthrough
CT: control target
= control target key end

     0   :  { %s825_s18 = smov 0   ;;  %s946_s0 = inlined_call_operand.vmem [shape: bf16[96,128], index: 0, kind: input, shape index: {}]   ;;  %s947_s1 = inlined_call_operand.vmem [shape: bf16[128,128], index: 1, kind: input, shape index: {}]   ;;  %s948_s2 = inlined_call_operand.vmem [shape: f32[1,128], index: 2, kind: input, shape index: {}]   ;;  %s949_s3 = inlined_call_operand.vmem [shape: bf16[128,128], index: 3, kind: input, shape index: {}]   ;;  %s950_s4 = inlined_call_operand.vmem [shape: f32[1,128], index: 4, kind: input, shape index: {}]   ;;  %s951_s5 = inlined_call_operand.vmem [shape: bf16[96,128], index: 5, kind: output, shape index: {}]  }
   0x1 LB: > { %s616_s19 = sadd.s32 4294967295, %s791_s18   ;;  %p620_p0 = scmp.ge.s32.totalorder %s791_s18, 1  ;;  %s791_s18 = sphi %s825_s18, %s15_s18  }
   0x2   : > { %p188_p1 = scmp.lt.s32.totalorder %s791_s18, 3 }
   0x4   : > { %p189_p2 = pnand %p620_p0, %p188_p1 }
   0x5   : > { %s216_s26 = smul.u32 (!%p189_p2), 6, %s616_s19 }
   0x6   : > { %192 = sbr.rel (%p189_p2) target bundleno = 467 (0x1d3), region = 40 }
   0x7   : > { %p217_p3 = scmp.lt.s32.totalorder (!%p189_p2), %s216_s26, 11 }
   0xb   : > { %v763_v0 = vld [vmem:[%s947_s1 + $0x38] sm:$0xff]   ;;  %v793_v1 = vmov 0.0   ;;  %v764_v2 = vld [vmem:[%s947_s1 + $0x30] sm:$0xff]   ;;  %vm794_vm0 = vmmov 0   ;;  %v765_v3 = vld [vmem:[%s947_s1 + $0x28] sm:$0xff]   ;;  %s953_s26 = smov (!%p217_p3, %s216_s26), 11 }
   0xc   : > { %697 = vmatprep.subr.bf16.mxu0 %v793_v1  ;;  %725 = vmatprep.subr.bf16.mxu1 %v793_v1  ;;  %v774_v4 = vld [vmem:[%s949_s3 + $0x38] sm:$0xff]   ;;  %v766_v5 = vld [vmem:[%s947_s1 + $0x20] sm:$0xff]   ;;  %v775_v6 = vld [vmem:[%s949_s3 + $0x30] sm:$0xff]   ;;  %s621_s16 = sshll.u32 %s953_s26, 2 }
   0xd   : > { %698 = vmatpush3.bf16.msra.mxu0 %v763_v0  ;;  %713 = vmatprep.mubr.msk.bf16.mxu0 %vm794_vm0, %v793_v1  ;;  %v767_v7 = vld [vmem:[%s947_s1 + $0x18] sm:$0xff]   ;;  %v776_v8 = vld [vmem:[%s949_s3 + $0x28] sm:$0xff]   ;;  %v768_v9 = vld [vmem:[%s947_s1 + $0x10] sm:$0xff]   ;;  %s220_s24 = scalar_lea.vmem %s946_s0, %s621_s16  ;;  %s226_s15 = scalar_lea.vmem %s951_s5, %s621_s16 }
   0xe   : > { %699 = vmatprep.subr.bf16.mxu0 %v793_v1  ;;  %741 = vmatprep.mubr.msk.bf16.mxu1 %vm794_vm0, %v793_v1  ;;  %v777_v10 = vld [vmem:[%s949_s3 + $0x20] sm:$0xff]   ;;  %v769_v11 = vld [vmem:[%s947_s1 + $0x8] sm:$0xff]   ;;  %v778_v12 = vld [vmem:[%s949_s3 + $0x18] sm:$0xff]  }
   0xf   : > { %726 = vmatpush3.bf16.msra.mxu1 %v774_v4  ;;  %v770_v13 = vld [vmem:[%s947_s1] sm:$0xff]   ;;  %v903_v15 = vld [vmem:[%s220_s24 + $0x8] sm:$0xff]   ;;  %v908_v16 = vld [vmem:[%s220_s24 + $0x10] sm:$0xff]  }
  0x10   : > { %727 = vmatprep.subr.bf16.mxu1 %v793_v1  ;;  %v896_v14 = vld [vmem:[%s220_s24] sm:$0xff]   ;;  %v779_v17 = vld [vmem:[%s949_s3 + $0x10] sm:$0xff]   ;;  %v780_v18 = vld [vmem:[%s949_s3 + $0x8] sm:$0xff]   ;;  %v520_v63 = vunpack.c.l.bf16 %v903_v15  ;;  %v521_v0 = vunpack.c.h.bf16 %v903_v15 }
  0x11   : > { %700 = vmatpush3.bf16.msra.mxu0 %v764_v2  ;;  %v781_v19 = vld [vmem:[%s949_s3] sm:$0xff]   ;;  %v518_v52 = vunpack.c.l.bf16 %v896_v14  ;;  %v519_v53 = vunpack.c.h.bf16 %v896_v14 }
  0x12   : > { %701 = vmatprep.subr.bf16.mxu0 %v793_v1  ;;  %v623_v20 = vld [vmem:[%s948_s2] ss:$0 sm:$0xff] }
  0x13   : > { %728 = vmatpush3.bf16.msra.mxu1 %v775_v6  ;;  %v635_v48 = vld [vmem:[%s950_s4] ss:$0 sm:$0xff] }
  0x14   : > { %729 = vmatprep.subr.bf16.mxu1 %v793_v1 }
  0x15   : > { %702 = vmatpush3.bf16.msra.mxu0 %v765_v3 }
  0x16   : > { %703 = vmatprep.subr.bf16.mxu0 %v793_v1 }
  0x17   : > { %730 = vmatpush3.bf16.msra.mxu1 %v776_v8 }
  0x18   : > { %731 = vmatprep.subr.bf16.mxu1 %v793_v1 }
  0x19   : > { %704 = vmatpush3.bf16.msra.mxu0 %v766_v5 }
  0x1a   : > { %705 = vmatprep.subr.bf16.mxu0 %v793_v1 }
  0x1b   : > { %732 = vmatpush3.bf16.msra.mxu1 %v777_v10  ;;  %v522_v10 = vunpack.c.l.bf16 %v908_v16 }
  0x1c   : > { %733 = vmatprep.subr.bf16.mxu1 %v793_v1 }
  0x1d   : > { %706 = vmatpush3.bf16.msra.mxu0 %v767_v7 }
  0x1e   : > { %707 = vmatprep.subr.bf16.mxu0 %v793_v1 }
  0x1f   : > { %734 = vmatpush3.bf16.msra.mxu1 %v778_v12 }
  0x20   : > { %735 = vmatprep.subr.bf16.mxu1 %v793_v1 }
  0x21   : > { %708 = vmatpush3.bf16.msra.mxu0 %v768_v9 }
  0x22   : > { %709 = vmatprep.subr.bf16.mxu0 %v793_v1 }
  0x23   : > { %736 = vmatpush3.bf16.msra.mxu1 %v779_v17 }
  0x24   : > { %737 = vmatprep.subr.bf16.mxu1 %v793_v1 }
  0x25   : > { %710 = vmatpush3.bf16.msra.mxu0 %v769_v11  ;;  %v523_v11 = vunpack.c.h.bf16 %v908_v16 }
  0x26   : > { %711 = vmatprep.subr.bf16.mxu0 %v793_v1 }
  0x27   : > { %738 = vmatpush3.bf16.msra.mxu1 %v780_v18 }
  0x28   : > { %739 = vmatprep.subr.bf16.mxu1 %v793_v1 }
  0x29   : > { %712 = vmatpush3.bf16.msra.mxu0 %v770_v13 }
  0x2b   : > { %740 = vmatpush3.bf16.msra.mxu1 %v781_v19 }
  0x2c   : > { %714 = vmatmul.mubr.bf16.vlgmr.msra.gmra.mxu0 %v896_v14 }
  0x2d   : > { %717 = vmatprep.mubr.msk.bf16.mxu0 %vm794_vm0, %v793_v1 }
  0x34   : > { %718 = vmatmul.mubr.bf16.gmra.mxu0 %v903_v15 }
  0x35   : > { %721 = vmatprep.mubr.msk.bf16.mxu0 %vm794_vm0, %v793_v1 }
  0x3c   : > { %722 = vmatmul.mubr.bf16.gmra.mxu0 %v908_v16 }
  0xec   : > { %v358_v21 = vpop.f32.mrf.mxu0 }
  0xed   : > { %v359_v23 = vadd.f32 %v623_v20, %v358_v21 }
  0xee   : > { %v715_v22 = vpop.f32.mrf.mxu0 }
  0xef   : > { %v381_v27 = vmax.f32 %v359_v23, 0.0 }
  0xf0   : > { %v361_v24 = vpop.f32.mrf.mxu0 }
  0xf1   : > { %v362_v25 = vadd.f32 %v623_v20, %v361_v24 }
  0xf2   : > { %v716_v26 = vpop.f32.mrf.mxu0 }
  0xf3   : > { %v382_v28 = vmax.f32 %v362_v25, 0.0 }
  0xf4   : > { %v366_v29 = vpop.f32.mrf.mxu0 }
  0xf5   : > { %v387_v30 = vpack.c.bf16 %v382_v28, %v381_v27  ;;  %v367_v32 = vadd.f32 %v623_v20, %v366_v29 }
  0xf6   : > { %v719_v31 = vpop.f32.mrf.mxu0 }
  0xf7   : > { %742 = vmatmul.mubr.bf16.vlgmr.msra.gmra.mxu1 %v387_v30  ;;  %v383_v36 = vmax.f32 %v367_v32, 0.0 }
  0xf8   : > { %v369_v33 = vpop.f32.mrf.mxu0  ;;  %745 = vmatprep.mubr.msk.bf16.mxu1 %vm794_vm0, %v793_v1 }
  0xf9   : > { %v370_v34 = vadd.f32 %v623_v20, %v369_v33 }
  0xfa   : > { %v720_v35 = vpop.f32.mrf.mxu0 }
  0xfb   : > { %v384_v37 = vmax.f32 %v370_v34, 0.0 }
  0xfc   : > { %v374_v38 = vpop.f32.mrf.mxu0 }
  0xfd   : > { %v388_v39 = vpack.c.bf16 %v384_v37, %v383_v36  ;;  %v375_v41 = vadd.f32 %v623_v20, %v374_v38 }
  0xfe   : > { %v723_v40 = vpop.f32.mrf.mxu0 }
  0xff   : > { %746 = vmatmul.mubr.bf16.gmra.mxu1 %v388_v39  ;;  %v385_v45 = vmax.f32 %v375_v41, 0.0 }
 0x100   : > { %v377_v42 = vpop.f32.mrf.mxu0  ;;  %749 = vmatprep.mubr.msk.bf16.mxu1 %vm794_vm0, %v793_v1 }
 0x101   : > { %v378_v43 = vadd.f32 %v623_v20, %v377_v42 }
 0x102   : > { %v724_v44 = vpop.f32.mrf.mxu0 }
 0x103   : > { %v386_v46 = vmax.f32 %v378_v43, 0.0 }
 0x105   : > { %v389_v47 = vpack.c.bf16 %v386_v46, %v385_v45 }
 0x107   : > { %750 = vmatmul.mubr.bf16.gmra.mxu1 %v389_v47 }
 0x1b7   : > { %v495_v49 = vpop.f32.mrf.mxu1 }
 0x1b8   : > { %v496_v51 = vadd.f32 %v635_v48, %v495_v49 }
 0x1b9   : > { %v743_v50 = vpop.f32.mrf.mxu1 }
 0x1ba   : > { %v524_v57 = vadd.f32 %v518_v52, %v496_v51 }
 0x1bb   : > { %v498_v54 = vpop.f32.mrf.mxu1 }
 0x1bc   : > { %v499_v55 = vadd.f32 %v635_v48, %v498_v54 }
 0x1bd   : > { %v744_v56 = vpop.f32.mrf.mxu1 }
 0x1be   : > { %v525_v58 = vadd.f32 %v519_v53, %v499_v55 }
 0x1bf   : > { %v503_v59 = vpop.f32.mrf.mxu1 }
 0x1c0   : > { %v661_v60 = vpack.c.bf16 %v525_v58, %v524_v57  ;;  %v504_v62 = vadd.f32 %v635_v48, %v503_v59 }
 0x1c1   : > { %v747_v61 = vpop.f32.mrf.mxu1 }
 0x1c2   : > { %662 = vst [vmem:[%s226_s15] sm:$0xff] %v661_v60   ;;  %v526_v4 = vadd.f32 %v520_v63, %v504_v62 }
 0x1c3   : > { %v506_v1 = vpop.f32.mrf.mxu1 }
 0x1c4   : > { %v507_v2 = vadd.f32 %v635_v48, %v506_v1 }
 0x1c5   : > { %v748_v3 = vpop.f32.mrf.mxu1 }
 0x1c6   : > { %v527_v5 = vadd.f32 %v521_v0, %v507_v2 }
 0x1c7   : > { %v511_v6 = vpop.f32.mrf.mxu1 }
 0x1c8   : > { %v666_v7 = vpack.c.bf16 %v527_v5, %v526_v4  ;;  %v512_v9 = vadd.f32 %v635_v48, %v511_v6 }
 0x1c9   : > { %v751_v8 = vpop.f32.mrf.mxu1 }
 0x1ca   : > { %673 = vst [vmem:[%s226_s15 + $0x8] sm:$0xff] %v666_v7   ;;  %v528_v17 = vadd.f32 %v522_v10, %v512_v9 }
 0x1cb   : > { %v514_v12 = vpop.f32.mrf.mxu1 }
 0x1cc   : > { %v515_v13 = vadd.f32 %v635_v48, %v514_v12 }
 0x1cd   : > { %v752_v14 = vpop.f32.mrf.mxu1 }
 0x1ce   : > { %v529_v18 = vadd.f32 %v523_v11, %v515_v13 }
 0x1d0   : > { %v671_v15 = vpack.c.bf16 %v529_v18, %v528_v17 }
 0x1d2   : > { %674 = vst [vmem:[%s226_s15 + $0x10] sm:$0xff] %v671_v15  }
 0x1d3 PF: > { %s15_s18 = sadd.s32 1, %s791_s18  }
 0x1d4   : > { %p12_p4 = scmp.ge.s32.totalorder %s15_s18, 4  }
 0x1d6   :  { %14 = sbr.rel (!%p12_p4) target bundleno = 1 (0x1), region = 70 }

</bundles_post_ra>
